<compile_context>
chip_gen: v7x
topology: tpu7x:2x2x1
jax: 0.10.0
libtpu: 0.0.40
codegen_flags: <defaults>
</compile_context>

<pallas_src>
import functools

import jax
import jax.numpy as jnp
from jax.experimental import pallas as pl
from jax.experimental.pallas import tpu as pltpu

EPS = 1e-5

# Per-grid-step tile budget (input + output slabs for one step); double
# buffering keeps the working set ~4x this -> well inside v7x's 64 MiB VMEM.
_TILE_BUDGET = 4 << 20
# Never unroll more than this many batch elements per grid step.
_MAX_NB = 32


def _pick_tiles(N, Ppad, Cin, Cout, bytes_per_elem=4):
    """Pick (Nb, TP): TP = largest multiple-of-128 divisor of Ppad fitting the
    per-step budget; Nb = largest divisor of N (capped) so each step moves a
    big, lane-dense slab instead of a few KB."""
    TP = 128
    tp = 128
    while tp <= Ppad:
        if Ppad % tp == 0 and (Cin + Cout) * tp * bytes_per_elem <= _TILE_BUDGET:
            TP = tp
        tp += 128
    per_n = (Cin + Cout) * TP * bytes_per_elem
    cap = max(1, min(N, _MAX_NB, _TILE_BUDGET // max(per_n, 1)))
    Nb = 1
    for d in range(cap, 0, -1):
        if N % d == 0:
            Nb = d
            break
    return Nb, TP


# ---------------------------------------------------------------------------
# Kernels
# ---------------------------------------------------------------------------
def _stats_kernel(x_ref, w_ref, sum_ref, ssq_ref):
    """Pass 1 (Cout >= Cin): per-channel sum / sum-of-squares of z = W @ x.
    z stays in VMEM; stats are per-batch-block partials (megacore-safe)."""
    @pl.when(pl.program_id(1) == 0)
    def _init():
        sum_ref[...] = jnp.zeros_like(sum_ref)
        ssq_ref[...] = jnp.zeros_like(ssq_ref)

    w = w_ref[...]
    for i in range(x_ref.shape[0]):                       # Nb small, static unroll
        z = jnp.dot(w, x_ref[i], preferred_element_type=jnp.float32)   # (Cout, TP)
        sum_ref[...] += jnp.sum(z, axis=1, keepdims=True)               # XLU lane-reduce
        ssq_ref[...] += jnp.sum(z * z, axis=1, keepdims=True)


def _conv_stats_kernel(x_ref, w_ref, b_ref, y_ref, sum_ref, ssq_ref):
    """Pass 1 (Cout < Cin): y = W@x + b stored in bf16 + per-channel stats on z."""
    @pl.when(pl.program_id(1) == 0)
    def _init():
        sum_ref[...] = jnp.zeros_like(sum_ref)
        ssq_ref[...] = jnp.zeros_like(ssq_ref)

    w = w_ref[...]
    b = b_ref[...]
    for i in range(x_ref.shape[0]):
        z = jnp.dot(w, x_ref[i], preferred_element_type=jnp.float32)   # (Cout, TP)
        y_ref[i] = (z + b).astype(y_ref.dtype)            # lane-dense bf16 store
        sum_ref[...] += jnp.sum(z, axis=1, keepdims=True)
        ssq_ref[...] += jnp.sum(z * z, axis=1, keepdims=True)


def _folded_conv_kernel(x_ref, w_ref, b_ref, o_ref):
    """Pass 2 (Cout >= Cin): out = (scale*W) @ x + (scale*b + shift)."""
    w = w_ref[...]
    b = b_ref[...]
    for i in range(x_ref.shape[0]):
        z = jnp.dot(w, x_ref[i], preferred_element_type=jnp.float32)
        o_ref[i] = (z + b).astype(o_ref.dtype)


def _bn_affine_kernel(y_ref, scale_ref, shift_ref, o_ref):
    """Pass 2 (Cout < Cin, large shapes): per-channel affine on the bf16 y."""
    sc = scale_ref[...]
    sh = shift_ref[...]
    for i in range(y_ref.shape[0]):
        o_ref[i] = (y_ref[i].astype(jnp.float32) * sc + sh).astype(o_ref.dtype)


# ---------------------------------------------------------------------------
# Wrapper
# ---------------------------------------------------------------------------
def _out_conv_impl(x_nchw, params, *, pallas_affine_min_bytes=1 << 20):
    """OutConv forward.  x_nchw: [N, Cin, H, W] -> [N, Cout, H, W] (float32)."""
    w, b, gamma, beta = params
    N, Cin, H, W = x_nchw.shape
    Cout = w.shape[0]
    P = H * W
    Ppad = -(-P // 128) * 128
    M = N * P                                # true pixel count for BN statistics

    x = x_nchw.reshape(N, Cin, P).astype(jnp.float32)      # NCHW, no transpose
    if Ppad != P:
        # Zero-pad pixels up to a lane multiple.  Stats are accumulated on the
        # bias-free z = W @ x, so zero pixels contribute exactly zero (no
        # correction); padded output columns are sliced off at the end.
        x = jnp.pad(x, ((0, 0), (0, 0), (0, Ppad - P)))

    w2 = w.reshape(Cout, Cin).astype(jnp.float32)
    b2 = b.reshape(Cout, 1).astype(jnp.float32)
    gamma2 = gamma.reshape(Cout, 1).astype(jnp.float32)
    beta2 = beta.reshape(Cout, 1).astype(jnp.float32)

    Nb, TP = _pick_tiles(N, Ppad, Cin, Cout)
    gn, gt = N // Nb, Ppad // TP

    blk_x = Nb * Cin * TP * 4
    blk_o = Nb * Cout * TP * 4
    vmem_limit = int(min(max(4 * (blk_x + blk_o) + (4 << 20), 16 << 20), 32 << 20))

    x_spec = pl.BlockSpec((Nb, Cin, TP), lambda n, t: (n, 0, t))
    w_spec = pl.BlockSpec((Cout, Cin), lambda n, t: (0, 0))
    vec_spec = pl.BlockSpec((Cout, 1), lambda n, t: (0, 0))
    stat_spec = pl.BlockSpec((None, Cout, 1), lambda n, t: (n, 0, 0))
    y_spec = pl.BlockSpec((Nb, Cout, TP), lambda n, t: (n, 0, t))

    conv_flops = 2 * N * Ppad * Cin * Cout
    fold = Cout >= Cin   # skip the y HBM round-trip when re-reading x is cheaper

    if fold:
        # ---- pass 1: stats only (z never leaves VMEM) -------------------------
        z_sum, z_ssq = pl.pallas_call(
            _stats_kernel,
            out_shape=(jax.ShapeDtypeStruct((gn, Cout, 1), jnp.float32),
                       jax.ShapeDtypeStruct((gn, Cout, 1), jnp.float32)),
            grid=(gn, gt),
            in_specs=[x_spec, w_spec],
            out_specs=(stat_spec, stat_spec),
            compiler_params=pltpu.CompilerParams(
                dimension_semantics=("parallel", "arbitrary"),
                vmem_limit_bytes=vmem_limit),
            cost_estimate=pl.CostEstimate(
                flops=conv_flops, transcendentals=0,
                bytes_accessed=4 * (N * Cin * Ppad + Cin * Cout + 2 * gn * Cout)),
        )(x, w2)
    else:
        # ---- pass 1: conv (y stored bf16, halves y HBM traffic) + stats -------
        y, z_sum, z_ssq = pl.pallas_call(
            _conv_stats_kernel,
            out_shape=(jax.ShapeDtypeStruct((N, Cout, Ppad), jnp.bfloat16),
                       jax.ShapeDtypeStruct((gn, Cout, 1), jnp.float32),
                       jax.ShapeDtypeStruct((gn, Cout, 1), jnp.float32)),
            grid=(gn, gt),
            in_specs=[x_spec, w_spec, vec_spec],
            out_specs=(y_spec, stat_spec, stat_spec),
            compiler_params=pltpu.CompilerParams(
                dimension_semantics=("parallel", "arbitrary"),
                vmem_limit_bytes=vmem_limit),
            cost_estimate=pl.CostEstimate(
                flops=conv_flops, transcendentals=0,
                bytes_accessed=(4 * N * Cin * Ppad + 2 * N * Cout * Ppad
                                + 4 * (Cin * Cout + Cout) + 8 * gn * Cout)),
        )(x, w2, b2)

    # ---- finalize BN stats (training-mode: biased variance over N*H*W) --------
    # Stats were accumulated on bias-free z = W @ x: mean_y = mean_z + b and
    # var_y = var_z (shift-invariant), which also reduces cancellation risk.
    mean_z = jnp.sum(z_sum, axis=0) / M                                # (Cout, 1)
    var = jnp.maximum(jnp.sum(z_ssq, axis=0) / M - mean_z * mean_z, 0.0)
    mean = mean_z + b2
    scale = gamma2 * jax.lax.rsqrt(var + EPS)                          # (Cout, 1)
    shift = beta2 - mean * scale
    # TODO(synk): nn.BatchNorm2d's running_mean/running_var buffer updates are a
    # training-time side effect only and are not emitted (forward output unaffected).

    if fold:
        # ---- pass 2: BN folded into the conv, fully parallel -------------------
        w_fold = scale * w2                                            # (Cout, Cin)
        b_fold = scale * b2 + shift                                    # (Cout, 1)
        out = pl.pallas_call(
            _folded_conv_kernel,
            out_shape=jax.ShapeDtypeStruct((N, Cout, Ppad), jnp.float32),
            grid=(gn, gt),
            in_specs=[x_spec, w_spec, vec_spec],
            out_specs=y_spec,
            compiler_params=pltpu.CompilerParams(
                dimension_semantics=("parallel", "parallel"),
                vmem_limit_bytes=vmem_limit),
            cost_estimate=pl.CostEstimate(
                flops=conv_flops, transcendentals=0,
                bytes_accessed=4 * (N * (Cin + Cout) * Ppad + Cin * Cout + Cout)),
        )(x, w_fold, b_fold)
    else:
        y_bytes = N * Cout * Ppad * (2 + 4)   # bf16 read + f32 write
        if y_bytes < pallas_affine_min_bytes:
            # Tiny problem: a second kernel launch costs more than the work;
            # let XLA fuse the per-channel affine (and anything downstream).
            out = y.astype(jnp.float32) * scale[None] + shift[None]
        else:
            out = pl.pallas_call(
                _bn_affine_kernel,
                out_shape=jax.ShapeDtypeStruct((N, Cout, Ppad), jnp.float32),
                grid=(gn, gt),
                in_specs=[y_spec, vec_spec, vec_spec],
                out_specs=y_spec,
                compiler_params=pltpu.CompilerParams(
                    dimension_semantics=("parallel", "parallel"),
                    vmem_limit_bytes=vmem_limit),
                cost_estimate=pl.CostEstimate(
                    flops=2 * N * Cout * Ppad, transcendentals=0,
                    bytes_accessed=y_bytes + 8 * Cout),
            )(y, scale, shift)

    if Ppad != P:
        out = out[:, :, :P]
    return out.reshape(N, Cout, H, W)


out_conv = jax.jit(_out_conv_impl, static_argnames=("pallas_affine_min_bytes",))


# ---------------------------------------------------------------------------
# Reference + params
# ---------------------------------------------------------------------------
def _reference(x_nchw, params):
    """Pure-JAX reference: 1x1 conv + training-mode BatchNorm2d."""
    w, b, gamma, beta = params
    Cout = w.shape[0]
    x = x_nchw.astype(jnp.float32)
    y = jnp.einsum('oi,nihw->nohw', w.reshape(Cout, -1).astype(jnp.float32), x) \
        + b.reshape(1, Cout, 1, 1)
    mean = jnp.mean(y, axis=(0, 2, 3), keepdims=True)
    var = jnp.mean((y - mean) ** 2, axis=(0, 2, 3), keepdims=True)
    yn = (y - mean) * jax.lax.rsqrt(var + EPS)
    return yn * gamma.reshape(1, Cout, 1, 1) + beta.reshape(1, Cout, 1, 1)


def init_params(key, in_channels, out_channels):
    """Deterministic params matching nn.Conv2d(k=1) / nn.BatchNorm2d shapes."""
    k1, k2, k3, k4 = jax.random.split(key, 4)
    w = 0.1 * jax.random.normal(k1, (out_channels, in_channels), jnp.float32)
    b = 0.05 * jax.random.normal(k2, (out_channels,), jnp.float32)
    gamma = 1.0 + 0.1 * jax.random.normal(k3, (out_channels,), jnp.float32)
    beta = 0.05 * jax.random.normal(k4, (out_channels,), jnp.float32)
    return (w, b, gamma, beta)


if __name__ == "__main__":
    key = jax.random.PRNGKey(0)
    kx, kp, kx2, kp2 = jax.random.split(key, 4)

    # --- path A (Cout >= Cin): stats-only pass + BN folded into the 1x1 conv ---
    N, Cin, Cout, H, W = 2, 4, 4, 16, 16
    x = jax.random.normal(kx, (N, Cin, H, W), jnp.float32)   # NCHW like PyTorch
    params = init_params(kp, Cin, Cout)
    out = jax.block_until_ready(out_conv(x, params, pallas_affine_min_bytes=1 << 20))
    ref = _reference(x, params)
    assert out.shape == (N, Cout, H, W)
    err = jnp.max(jnp.abs(out - ref))
    assert jnp.allclose(out, ref, atol=1e-4, rtol=1e-4), f"path A max abs err {err}"

    # --- path B (Cout < Cin): conv + bf16 y intermediate, affine second pass ---
    N2, Cin2, Cout2 = 2, 8, 4
    x2 = jax.random.normal(kx2, (N2, Cin2, H, W), jnp.float32)
    params2 = init_params(kp2, Cin2, Cout2)
    ref2 = _reference(x2, params2)
    # tiny shape -> XLA-fused jnp affine
    out2 = jax.block_until_ready(out_conv(x2, params2, pallas_affine_min_bytes=1 << 20))
    # force the Pallas affine kernel so the large-shape path is exercised too
    out3 = jax.block_until_ready(out_conv(x2, params2, pallas_affine_min_bytes=0))
    for o in (out2, out3):
        assert o.shape == (N2, Cout2, H, W)
        err2 = jnp.max(jnp.abs(o - ref2))
        # looser tolerance: the y intermediate is stored in bfloat16
        assert jnp.allclose(o, ref2, atol=5e-2, rtol=5e-2), f"path B max abs err {err2}"

    print("KERNEL_OK")
</pallas_src>

<mosaic_0001>
module attributes {stable_mosaic.version = 11 : i64} {
  func.func @_stats_kernel(%arg0: i32, %arg1: i32, %arg2: memref<2x4x256xf32, #tpu.memory_space<vmem>>, %arg3: memref<4x4xf32, #tpu.memory_space<vmem>>, %arg4: memref<1x4x1xf32, #tpu.memory_space<vmem>>, %arg5: memref<1x4x1xf32, #tpu.memory_space<vmem>>) attributes {dimension_semantics = [#tpu.dimension_semantics<parallel>, #tpu.dimension_semantics<arbitrary>], iteration_bounds = array<i64: 1, 1>, scalar_prefetch = 0 : i64, scratch_operands = 0 : i64, tpu.core_type = #tpu.core_type<tc>, window_params = [{transform_indices = @transform_0, window_bounds = array<i64: 2, 4, 256>}, {pipeline_mode = #tpu.pipeline_mode<synchronous>, transform_indices = @transform_1, window_bounds = array<i64: 4, 4>}, {transform_indices = @transform_2, window_bounds = array<i64: 1, 4, 1>}, {transform_indices = @transform_3, window_bounds = array<i64: 1, 4, 1>}]} {
    %c0_i32 = arith.constant 0 : i32
    %0 = arith.cmpi eq, %arg1, %c0_i32 : i32
    %1 = arith.extui %0 : i1 to i32
    %c0_i32_0 = arith.constant 0 : i32
    %2 = arith.cmpi ne, %1, %c0_i32_0 : i32
    scf.if %2 {
      %cst_36 = arith.constant 0.000000e+00 : f32
      %44 = vector.broadcast %cst_36 : f32 to vector<4x1xf32>
      %c0_37 = arith.constant 0 : index
      %c0_38 = arith.constant 0 : index
      %c0_39 = arith.constant 0 : index
      %45 = vector.load %arg4[%c0_37, %c0_38, %c0_39] : memref<1x4x1xf32, #tpu.memory_space<vmem>>, vector<1x4x1xf32>
      %46 = vector.shape_cast %45 : vector<1x4x1xf32> to vector<4x1xf32>
      %47 = vector.shape_cast %44 : vector<4x1xf32> to vector<1x4x1xf32>
      tpu.vector_store %arg4[%c0_37, %c0_38, %c0_39], %47 {strides = array<i32>} : memref<1x4x1xf32, #tpu.memory_space<vmem>>, vector<1x4x1xf32>,
      %cst_40 = arith.constant 0.000000e+00 : f32
      %48 = vector.broadcast %cst_40 : f32 to vector<4x1xf32>
      %c0_41 = arith.constant 0 : index
      %c0_42 = arith.constant 0 : index
      %c0_43 = arith.constant 0 : index
      %49 = vector.load %arg5[%c0_41, %c0_42, %c0_43] : memref<1x4x1xf32, #tpu.memory_space<vmem>>, vector<1x4x1xf32>
      %50 = vector.shape_cast %49 : vector<1x4x1xf32> to vector<4x1xf32>
      %51 = vector.shape_cast %48 : vector<4x1xf32> to vector<1x4x1xf32>
      tpu.vector_store %arg5[%c0_41, %c0_42, %c0_43], %51 {strides = array<i32>} : memref<1x4x1xf32, #tpu.memory_space<vmem>>, vector<1x4x1xf32>,
    } else {
    }
    %c0 = arith.constant 0 : index
    %c0_1 = arith.constant 0 : index
    %3 = vector.load %arg3[%c0, %c0_1] : memref<4x4xf32, #tpu.memory_space<vmem>>, vector<4x4xf32>
    %c0_2 = arith.constant 0 : index
    %c0_3 = arith.constant 0 : index
    %c0_4 = arith.constant 0 : index
    %4 = vector.load %arg2[%c0_2, %c0_3, %c0_4] : memref<2x4x256xf32, #tpu.memory_space<vmem>>, vector<1x4x256xf32>
    %5 = vector.shape_cast %4 : vector<1x4x256xf32> to vector<4x256xf32>
    %cst = arith.constant dense<0.000000e+00> : vector<4x256xf32>
    %6 = tpu.matmul %3, %5, %cst {dimension_numbers = #tpu.dot_dimension_numbers<[1], [0], [0], [1], [0, 0, 1, 1], [], []>} : vector<4x4xf32>, vector<4x256xf32>, vector<4x256xf32> -> vector<4x256xf32>
    %c0_5 = arith.constant 0 : index
    %c0_6 = arith.constant 0 : index
    %c0_7 = arith.constant 0 : index
    %7 = vector.load %arg4[%c0_5, %c0_6, %c0_7] : memref<1x4x1xf32, #tpu.memory_space<vmem>>, vector<1x4x1xf32>
    %8 = vector.shape_cast %7 : vector<1x4x1xf32> to vector<4x1xf32>
    %cst_8 = arith.constant dense<0.000000e+00> : vector<4xf32>
    %9 = vector.multi_reduction <add>, %6, %cst_8 [1] : vector<4x256xf32> to vector<4xf32>
    %10 = vector.shape_cast %9 : vector<4xf32> to vector<4x1xf32>
    %11 = arith.addf %8, %10 : vector<4x1xf32>
    %c0_9 = arith.constant 0 : index
    %c0_10 = arith.constant 0 : index
    %c0_11 = arith.constant 0 : index
    %12 = vector.load %arg4[%c0_9, %c0_10, %c0_11] : memref<1x4x1xf32, #tpu.memory_space<vmem>>, vector<1x4x1xf32>
    %13 = vector.shape_cast %12 : vector<1x4x1xf32> to vector<4x1xf32>
    %14 = vector.shape_cast %11 : vector<4x1xf32> to vector<1x4x1xf32>
    tpu.vector_store %arg4[%c0_9, %c0_10, %c0_11], %14 {strides = array<i32>} : memref<1x4x1xf32, #tpu.memory_space<vmem>>, vector<1x4x1xf32>,
    %c0_12 = arith.constant 0 : index
    %c0_13 = arith.constant 0 : index
    %c0_14 = arith.constant 0 : index
    %15 = vector.load %arg5[%c0_12, %c0_13, %c0_14] : memref<1x4x1xf32, #tpu.memory_space<vmem>>, vector<1x4x1xf32>
    %16 = vector.shape_cast %15 : vector<1x4x1xf32> to vector<4x1xf32>
    %17 = arith.mulf %6, %6 : vector<4x256xf32>
    %cst_15 = arith.constant dense<0.000000e+00> : vector<4xf32>
    %18 = vector.multi_reduction <add>, %17, %cst_15 [1] : vector<4x256xf32> to vector<4xf32>
    %19 = vector.shape_cast %18 : vector<4xf32> to vector<4x1xf32>
    %20 = arith.addf %16, %19 : vector<4x1xf32>
    %c0_16 = arith.constant 0 : index
    %c0_17 = arith.constant 0 : index
    %c0_18 = arith.constant 0 : index
    %21 = vector.load %arg5[%c0_16, %c0_17, %c0_18] : memref<1x4x1xf32, #tpu.memory_space<vmem>>, vector<1x4x1xf32>
    %22 = vector.shape_cast %21 : vector<1x4x1xf32> to vector<4x1xf32>
    %23 = vector.shape_cast %20 : vector<4x1xf32> to vector<1x4x1xf32>
    tpu.vector_store %arg5[%c0_16, %c0_17, %c0_18], %23 {strides = array<i32>} : memref<1x4x1xf32, #tpu.memory_space<vmem>>, vector<1x4x1xf32>,
    %c1 = arith.constant 1 : index
    %c0_19 = arith.constant 0 : index
    %c0_20 = arith.constant 0 : index
    %24 = vector.load %arg2[%c1, %c0_19, %c0_20] : memref<2x4x256xf32, #tpu.memory_space<vmem>>, vector<1x4x256xf32>
    %25 = vector.shape_cast %24 : vector<1x4x256xf32> to vector<4x256xf32>
    %cst_21 = arith.constant dense<0.000000e+00> : vector<4x256xf32>
    %26 = tpu.matmul %3, %25, %cst_21 {dimension_numbers = #tpu.dot_dimension_numbers<[1], [0], [0], [1], [0, 0, 1, 1], [], []>} : vector<4x4xf32>, vector<4x256xf32>, vector<4x256xf32> -> vector<4x256xf32>
    %c0_22 = arith.constant 0 : index
    %c0_23 = arith.constant 0 : index
    %c0_24 = arith.constant 0 : index
    %27 = vector.load %arg4[%c0_22, %c0_23, %c0_24] : memref<1x4x1xf32, #tpu.memory_space<vmem>>, vector<1x4x1xf32>
    %28 = vector.shape_cast %27 : vector<1x4x1xf32> to vector<4x1xf32>
    %cst_25 = arith.constant dense<0.000000e+00> : vector<4xf32>
    %29 = vector.multi_reduction <add>, %26, %cst_25 [1] : vector<4x256xf32> to vector<4xf32>
    %30 = vector.shape_cast %29 : vector<4xf32> to vector<4x1xf32>
    %31 = arith.addf %28, %30 : vector<4x1xf32>
    %c0_26 = arith.constant 0 : index
    %c0_27 = arith.constant 0 : index
    %c0_28 = arith.constant 0 : index
    %32 = vector.load %arg4[%c0_26, %c0_27, %c0_28] : memref<1x4x1xf32, #tpu.memory_space<vmem>>, vector<1x4x1xf32>
    %33 = vector.shape_cast %32 : vector<1x4x1xf32> to vector<4x1xf32>
    %34 = vector.shape_cast %31 : vector<4x1xf32> to vector<1x4x1xf32>
    tpu.vector_store %arg4[%c0_26, %c0_27, %c0_28], %34 {strides = array<i32>} : memref<1x4x1xf32, #tpu.memory_space<vmem>>, vector<1x4x1xf32>,
    %c0_29 = arith.constant 0 : index
    %c0_30 = arith.constant 0 : index
    %c0_31 = arith.constant 0 : index
    %35 = vector.load %arg5[%c0_29, %c0_30, %c0_31] : memref<1x4x1xf32, #tpu.memory_space<vmem>>, vector<1x4x1xf32>
    %36 = vector.shape_cast %35 : vector<1x4x1xf32> to vector<4x1xf32>
    %37 = arith.mulf %26, %26 : vector<4x256xf32>
    %cst_32 = arith.constant dense<0.000000e+00> : vector<4xf32>
    %38 = vector.multi_reduction <add>, %37, %cst_32 [1] : vector<4x256xf32> to vector<4xf32>
    %39 = vector.shape_cast %38 : vector<4xf32> to vector<4x1xf32>
    %40 = arith.addf %36, %39 : vector<4x1xf32>
    %c0_33 = arith.constant 0 : index
    %c0_34 = arith.constant 0 : index
    %c0_35 = arith.constant 0 : index
    %41 = vector.load %arg5[%c0_33, %c0_34, %c0_35] : memref<1x4x1xf32, #tpu.memory_space<vmem>>, vector<1x4x1xf32>
    %42 = vector.shape_cast %41 : vector<1x4x1xf32> to vector<4x1xf32>
    %43 = vector.shape_cast %40 : vector<4x1xf32> to vector<1x4x1xf32>
    tpu.vector_store %arg5[%c0_33, %c0_34, %c0_35], %43 {strides = array<i32>} : memref<1x4x1xf32, #tpu.memory_space<vmem>>, vector<1x4x1xf32>,
    return
  }
  func.func @transform_0(%arg0: i32, %arg1: i32) -> (i32, i32, i32) {
    %c0_i32 = arith.constant 0 : i32
    %c0_i32_0 = arith.constant 0 : i32
    return %arg0, %c0_i32, %arg1 : i32, i32, i32
  }
  func.func @transform_1(%arg0: i32, %arg1: i32) -> (i32, i32) {
    %c0_i32 = arith.constant 0 : i32
    %c0_i32_0 = arith.constant 0 : i32
    %c0_i32_1 = arith.constant 0 : i32
    return %c0_i32, %c0_i32_0 : i32, i32
  }
  func.func @transform_2(%arg0: i32, %arg1: i32) -> (i32, i32, i32) {
    %c0_i32 = arith.constant 0 : i32
    %c0_i32_0 = arith.constant 0 : i32
    %c0_i32_1 = arith.constant 0 : i32
    return %arg0, %c0_i32, %c0_i32_0 : i32, i32, i32
  }
  func.func @transform_3(%arg0: i32, %arg1: i32) -> (i32, i32, i32) {
    %c0_i32 = arith.constant 0 : i32
    %c0_i32_0 = arith.constant 0 : i32
    %c0_i32_1 = arith.constant 0 : i32
    return %arg0, %c0_i32, %c0_i32_0 : i32, i32, i32
  }
}

module attributes {stable_mosaic.version = 11 : i64} {
  func.func @_folded_conv_kernel(%arg0: i32, %arg1: i32, %arg2: memref<2x4x256xf32, #tpu.memory_space<vmem>>, %arg3: memref<4x4xf32, #tpu.memory_space<vmem>>, %arg4: memref<4x1xf32, #tpu.memory_space<vmem>>, %arg5: memref<2x4x256xf32, #tpu.memory_space<vmem>>) attributes {dimension_semantics = [#tpu.dimension_semantics<parallel>, #tpu.dimension_semantics<parallel>], iteration_bounds = array<i64: 1, 1>, scalar_prefetch = 0 : i64, scratch_operands = 0 : i64, tpu.core_type = #tpu.core_type<tc>, window_params = [{transform_indices = @transform_0, window_bounds = array<i64: 2, 4, 256>}, {pipeline_mode = #tpu.pipeline_mode<synchronous>, transform_indices = @transform_1, window_bounds = array<i64: 4, 4>}, {pipeline_mode = #tpu.pipeline_mode<synchronous>, transform_indices = @transform_2, window_bounds = array<i64: 4, 1>}, {transform_indices = @transform_3, window_bounds = array<i64: 2, 4, 256>}]} {
    %c0 = arith.constant 0 : index
    %c0_0 = arith.constant 0 : index
    %0 = vector.load %arg3[%c0, %c0_0] : memref<4x4xf32, #tpu.memory_space<vmem>>, vector<4x4xf32>
    %c0_1 = arith.constant 0 : index
    %c0_2 = arith.constant 0 : index
    %1 = vector.load %arg4[%c0_1, %c0_2] : memref<4x1xf32, #tpu.memory_space<vmem>>, vector<4x1xf32>
    %c0_3 = arith.constant 0 : index
    %c0_4 = arith.constant 0 : index
    %c0_5 = arith.constant 0 : index
    %2 = vector.load %arg2[%c0_3, %c0_4, %c0_5] : memref<2x4x256xf32, #tpu.memory_space<vmem>>, vector<1x4x256xf32>
    %3 = vector.shape_cast %2 : vector<1x4x256xf32> to vector<4x256xf32>
    %cst = arith.constant dense<0.000000e+00> : vector<4x256xf32>
    %4 = tpu.matmul %0, %3, %cst {dimension_numbers = #tpu.dot_dimension_numbers<[1], [0], [0], [1], [0, 0, 1, 1], [], []>} : vector<4x4xf32>, vector<4x256xf32>, vector<4x256xf32> -> vector<4x256xf32>
    %5 = vector.broadcast %1 : vector<4x1xf32> to vector<4x256xf32>
    %6 = arith.addf %4, %5 : vector<4x256xf32>
    %c0_6 = arith.constant 0 : index
    %c0_7 = arith.constant 0 : index
    %c0_8 = arith.constant 0 : index
    %7 = vector.load %arg5[%c0_6, %c0_7, %c0_8] : memref<2x4x256xf32, #tpu.memory_space<vmem>>, vector<1x4x256xf32>
    %8 = vector.shape_cast %7 : vector<1x4x256xf32> to vector<4x256xf32>
    %9 = vector.shape_cast %6 : vector<4x256xf32> to vector<1x4x256xf32>
    tpu.vector_store %arg5[%c0_6, %c0_7, %c0_8], %9 {strides = array<i32>} : memref<2x4x256xf32, #tpu.memory_space<vmem>>, vector<1x4x256xf32>,
    %c1 = arith.constant 1 : index
    %c0_9 = arith.constant 0 : index
    %c0_10 = arith.constant 0 : index
    %10 = vector.load %arg2[%c1, %c0_9, %c0_10] : memref<2x4x256xf32, #tpu.memory_space<vmem>>, vector<1x4x256xf32>
    %11 = vector.shape_cast %10 : vector<1x4x256xf32> to vector<4x256xf32>
    %cst_11 = arith.constant dense<0.000000e+00> : vector<4x256xf32>
    %12 = tpu.matmul %0, %11, %cst_11 {dimension_numbers = #tpu.dot_dimension_numbers<[1], [0], [0], [1], [0, 0, 1, 1], [], []>} : vector<4x4xf32>, vector<4x256xf32>, vector<4x256xf32> -> vector<4x256xf32>
    %13 = vector.broadcast %1 : vector<4x1xf32> to vector<4x256xf32>
    %14 = arith.addf %12, %13 : vector<4x256xf32>
    %c1_12 = arith.constant 1 : index
    %c0_13 = arith.constant 0 : index
    %c0_14 = arith.constant 0 : index
    %15 = vector.load %arg5[%c1_12, %c0_13, %c0_14] : memref<2x4x256xf32, #tpu.memory_space<vmem>>, vector<1x4x256xf32>
    %16 = vector.shape_cast %15 : vector<1x4x256xf32> to vector<4x256xf32>
    %17 = vector.shape_cast %14 : vector<4x256xf32> to vector<1x4x256xf32>
    tpu.vector_store %arg5[%c1_12, %c0_13, %c0_14], %17 {strides = array<i32>} : memref<2x4x256xf32, #tpu.memory_space<vmem>>, vector<1x4x256xf32>,
    return
  }
  func.func @transform_0(%arg0: i32, %arg1: i32) -> (i32, i32, i32) {
    %c0_i32 = arith.constant 0 : i32
    %c0_i32_0 = arith.constant 0 : i32
    return %arg0, %c0_i32, %arg1 : i32, i32, i32
  }
  func.func @transform_1(%arg0: i32, %arg1: i32) -> (i32, i32) {
    %c0_i32 = arith.constant 0 : i32
    %c0_i32_0 = arith.constant 0 : i32
    %c0_i32_1 = arith.constant 0 : i32
    return %c0_i32, %c0_i32_0 : i32, i32
  }
  func.func @transform_2(%arg0: i32, %arg1: i32) -> (i32, i32) {
    %c0_i32 = arith.constant 0 : i32
    %c0_i32_0 = arith.constant 0 : i32
    %c0_i32_1 = arith.constant 0 : i32
    return %c0_i32, %c0_i32_0 : i32, i32
  }
  func.func @transform_3(%arg0: i32, %arg1: i32) -> (i32, i32, i32) {
    %c0_i32 = arith.constant 0 : i32
    %c0_i32_0 = arith.constant 0 : i32
    return %arg0, %c0_i32, %arg1 : i32, i32, i32
  }
}

</mosaic_0001>

<bundles_post_ra>
// kernel: _out_conv_impl.3
= control target key start
LH: loop header
LB: loop body
LE: loop exit
PB: predicated region body
PF: predicated region fallthrough
CT: control target
= control target key end

     0   :  { %vm28_vm0 = vcmask 1043456   ;;  %v211_v2 = vmov 0.0   ;;  %v212_v5 = vmov 0   ;;  %vm24_vm1 = vcmask 31744   ;;  %s255_s0 = inlined_call_operand.vmem [shape: f32[2,4,256], index: 0, kind: input, shape index: {}]   ;;  %s256_s1 = inlined_call_operand.vmem [shape: f32[4,4], index: 1, kind: input, shape index: {}]   ;;  %s257_s2 = inlined_call_operand.vmem [shape: f32[4,1], index: 2, kind: input, shape index: {}]   ;;  %s258_s3 = inlined_call_operand.vmem [shape: f32[2,4,256], index: 3, kind: output, shape index: {}]  }
   0x1   :  { %v16_v0 = vld [vmem:[%s255_s0] sm:$0xff]  ;;  %v201_v1 = vld [vmem:[%s255_s0 + $0x8] sm:$0xff]  ;;  %97 = vmatprep.mubr.f32.mxu0 %v211_v2  ;;  %181 = vmatprep.mubr.f32.mxu1 %v211_v2 }
   0x2   :  { %v23_v3 = vcombine.high %v16_v0, %v16_v0  ;;  %v112_v4 = vcombine.high %v201_v1, %v201_v1  ;;  %208 = vset.pattern.permute.xlu0 %v212_v5  ;;  %v15_v6 = vld [vmem:[%s257_s2] sm:$0xf] }
   0x3   :  { %v14_v7 = vld [vmem:[%s256_s1] sm:$0xf]  ;;  %19 = vperm.xlu0 %208, %v15_v6  }
   0x4   :  { %198 = vmatprep.subr.msk.mxu0 %vm28_vm0, %v23_v3  ;;  %202 = vmatprep.subr.msk.mxu1 %vm28_vm0, %v112_v4 }
   0x5   :  { %199 = vmatpush1.msk.msra.mxu0 %vm28_vm0, %v16_v0  ;;  %203 = vmatpush1.msk.msra.mxu1 %vm28_vm0, %v201_v1 }
   0x6   :  { %200 = vmatmul.mubr.msk.f32.vlgmr.msra.gmra.mrb[0].mxu0 %vm24_vm1, %v14_v7  ;;  %204 = vmatmul.mubr.msk.f32.vlgmr.msra.gmra.mrb[0].mxu1 %vm24_vm1, %v14_v7 }
  0x82   :  { %v20_v8 = vpop.permute.xlu0 %19 }
  0xd9   :  { %v99_v9 = vpop.f32.mrb[0].mxu0  ;;  %v183_v10 = vpop.f32.mrb[0].mxu1 }
  0xda   :  { %v100_v11 = vadd.f32 %v99_v9, %v20_v8  ;;  %v184_v12 = vadd.f32 %v183_v10, %v20_v8  ;;  %v101_v13 = vpop.f32.mrb[1].mxu0  ;;  %v185_v14 = vpop.f32.mrb[1].mxu1 }
  0xdb   :  { %v102_v15 = vadd.f32 %v101_v13, %v20_v8  ;;  %v186_v16 = vadd.f32 %v185_v14, %v20_v8 }
  0xdd   :  { %v106_v17 = vcombine.low %v100_v11, %v102_v15  ;;  %v190_v18 = vcombine.low %v184_v12, %v186_v16 }
  0xdf   :  { %108 = vst [vmem:[%s258_s3] sm:$0xff] %v106_v17  ;;  %205 = vst [vmem:[%s258_s3 + $0x8] sm:$0xff] %v190_v18 }

// kernel: _out_conv_impl.2
= control target key start
LH: loop header
LB: loop body
LE: loop exit
PB: predicated region body
PF: predicated region fallthrough
CT: control target
= control target key end

     0   :  { %vm17_vm0 = vcmask 3072   ;;  %vm28_vm1 = vcmask 1043456   ;;  %v238_v1 = vmov 0.0   ;;  %vm24_vm2 = vcmask 31744   ;;  %s316_s0 = inlined_call_operand.vmem [shape: f32[2,4,256], index: 0, kind: input, shape index: {}]   ;;  %s317_s2 = inlined_call_operand.vmem [shape: f32[1,4,1], index: 2, kind: output, shape index: {0}]   ;;  %s318_s3 = inlined_call_operand.vmem [shape: f32[1,4,1], index: 3, kind: output, shape index: {1}]   ;;  %s319_s1 = inlined_call_operand.vmem [shape: f32[4,4], index: 1, kind: input, shape index: {}]  }
   0x1   :  { %v21_v0 = vld [vmem:[%s316_s0] sm:$0xff]  ;;  %18 = vst.msk [vmem:[%s317_s2] sm:$0xf] %vm17_vm0, %v238_v1  ;;  %19 = vst.msk [vmem:[%s318_s3] sm:$0xf] %vm17_vm0, %v238_v1  ;;  %97 = vmatprep.mubr.f32.mxu0 %v238_v1  ;;  %v231_v2 = vld [vmem:[%s316_s0 + $0x8] sm:$0xff]  ;;  %195 = vmatprep.mubr.f32.mxu1 %v238_v1 }
   0x2   :  { %v23_v3 = vcombine.high %v21_v0, %v21_v0  ;;  %v126_v4 = vcombine.high %v231_v2, %v231_v2  ;;  %v20_v5 = vld [vmem:[%s319_s1] sm:$0xf] }
   0x4   :  { %228 = vmatprep.subr.msk.mxu0 %vm28_vm1, %v23_v3  ;;  %232 = vmatprep.subr.msk.mxu1 %vm28_vm1, %v126_v4 }
   0x5   :  { %229 = vmatpush1.msk.msra.mxu0 %vm28_vm1, %v21_v0  ;;  %233 = vmatpush1.msk.msra.mxu1 %vm28_vm1, %v231_v2 }
   0x6   :  { %230 = vmatmul.mubr.msk.f32.vlgmr.msra.gmra.mrb[0].mxu0 %vm24_vm2, %v20_v5  ;;  %234 = vmatmul.mubr.msk.f32.vlgmr.msra.gmra.mrb[0].mxu1 %vm24_vm2, %v20_v5 }
   0x8   :  { %v104_v26 = vld [vmem:[%s317_s2] sm:$0xf] }
   0x9   :  { %v113_v29 = vld [vmem:[%s318_s3] sm:$0xf] }
  0xd9   :  { %v99_v6 = vpop.f32.mrb[0].mxu0  ;;  %v197_v7 = vpop.f32.mrb[0].mxu1 }
  0xda   :  { %v114_v8 = vmul.f32 %v99_v6, %v99_v6  ;;  %v101_v9 = vpop.f32.mrb[1].mxu0  ;;  %v105_v10 = vsel %vm28_vm1, %v99_v6, 0.0  ;;  %v211_v11 = vmul.f32 %v197_v7, %v197_v7  ;;  %v199_v12 = vpop.f32.mrb[1].mxu1  ;;  %v203_v13 = vsel %vm28_vm1, %v197_v7, 0.0 }
  0xdb   :  { %v106_v14 = vsel %vm28_vm1, %v101_v9, 0.0  ;;  %v115_v15 = vmul.f32 %v101_v9, %v101_v9  ;;  %v204_v16 = vsel %vm28_vm1, %v199_v12, 0.0  ;;  %v212_v17 = vmul.f32 %v199_v12, %v199_v12 }
  0xdc   :  { %v107_v18 = vadd.f32 %v106_v14, %v105_v10  ;;  %v116_v19 = vsel %vm28_vm1, %v114_v8, 0.0  ;;  %v205_v20 = vadd.f32 %v204_v16, %v203_v13  ;;  %v213_v21 = vsel %vm28_vm1, %v211_v11, 0.0 }
  0xdd   :  { %v117_v22 = vsel %vm28_vm1, %v115_v15, 0.0  ;;  %v214_v23 = vsel %vm28_vm1, %v212_v17, 0.0 }
  0xde   :  { %108 = vadd.xlane.f32.xlu0 %v107_v18  ;;  %v118_v24 = vadd.f32 %v117_v22, %v116_v19  ;;  %206 = vadd.xlane.f32.xlu1 %v205_v20  ;;  %v215_v25 = vadd.f32 %v214_v23, %v213_v21 }
  0xe2   :  { %119 = vadd.xlane.f32.xlu0 %v118_v24  ;;  %216 = vadd.xlane.f32.xlu1 %v215_v25 }
 0x16b   :  { %v109_v27 = vpop.xlane.xlu0 %108  ;;  %v207_v32 = vpop.xlane.xlu1 %206 }
 0x16c   :  { %v110_v28 = vadd.f32 %v109_v27, %v104_v26 }
 0x16e   :  { %112 = vst.msk [vmem:[%s317_s2] sm:$0xf] %vm17_vm0, %v110_v28 }
 0x16f   :  { %v120_v30 = vpop.xlane.xlu0 %119  ;;  %v217_v35 = vpop.xlane.xlu1 %216 }
 0x170   :  { %v121_v31 = vadd.f32 %v120_v30, %v113_v29 }
 0x172   :  { %122 = vst.msk [vmem:[%s318_s3] sm:$0xf] %vm17_vm0, %v121_v31 }
 0x175   :  { %v202_v33 = vld [vmem:[%s317_s2] sm:$0xf] }
 0x176   :  { %v208_v34 = vadd.f32 %v207_v32, %v202_v33 }
 0x178   :  { %209 = vst.msk [vmem:[%s317_s2] sm:$0xf] %vm17_vm0, %v208_v34 }
 0x179   :  { %v210_v36 = vld [vmem:[%s318_s3] sm:$0xf] }
 0x17a   :  { %v218_v37 = vadd.f32 %v217_v35, %v210_v36 }
 0x17c   :  { %219 = vst.msk [vmem:[%s318_s3] sm:$0xf] %vm17_vm0, %v218_v37 }

</bundles_post_ra>
